<compile_context>
chip_gen: v7x
topology: tpu7x:2x2x1
jax: 0.10.0
libtpu: 0.0.40
codegen_flags: <defaults>
</compile_context>

<pallas_src>
import math

import jax
import jax.numpy as jnp
from jax.experimental import pallas as pl
from jax.experimental.pallas import tpu as pltpu


def _add_pos_kernel(x_ref, pos_ref, o_ref):
    # x_ref / o_ref: (tB, tT, D); pos_ref: (tT, D), broadcast over batch dim.
    o_ref[...] = (x_ref[...] + pos_ref[...]).astype(o_ref.dtype)


def _sublane(dtype):
    # Minimum second-minor tile multiple per dtype width.
    return {4: 8, 2: 16, 1: 32}.get(jnp.dtype(dtype).itemsize, 8)


def _default_block_bytes():
    # Generation-aware per-operand block budget.
    #   v5e-class (16 MiB scoped-VMEM default): 2 MiB -> 3 ops x 2 bufs = 12 MiB
    #   v6e / v7x (32 MiB scoped default):      4 MiB -> 24 MiB
    try:
        kind = jax.devices()[0].device_kind.lower()
    except Exception:
        kind = ""
    if "v6" in kind or "v7" in kind:
        return 4 << 20
    return 2 << 20


def _pallas_add_pos(x, pos_table, *, block_bytes=None):
    """x: (B, T, D); pos_table: (max_len, D). Adds pos rows 0..T-1 to x."""
    if block_bytes is None:
        block_bytes = _default_block_bytes()

    B, T, D = x.shape
    itemsize = jnp.dtype(x.dtype).itemsize
    sub = _sublane(x.dtype)

    # Ragged T: pad up to the sublane multiple (keeps every block aligned and
    # VMEM bounded instead of one giant full-T block); slice the output later.
    T_pad = ((T + sub - 1) // sub) * sub
    if T_pad != T:
        x = jnp.pad(x, ((0, 0), (0, T_pad - T), (0, 0)))

    # Sequence tile: largest multiple of `sub` that divides T_pad and keeps a
    # (tT, D) slab within the block budget -> no partial tail block.
    row_bytes = D * itemsize
    rows_cap = max(sub, (block_bytes // row_bytes) // sub * sub)
    tT = sub
    c = (min(T_pad, rows_cap) // sub) * sub
    while c >= sub:
        if T_pad % c == 0:
            tT = c
            break
        c -= sub

    # Batch tile: only when the whole (padded) sequence is a single seq block
    # and much smaller than the budget, pack several batch rows per grid step
    # so per-step overhead is amortized for short-T / large-B shapes.
    tB = 1
    if tT == T_pad:
        per_batch = T_pad * row_bytes
        cap = min(B, max(1, block_bytes // per_batch))
        tB = cap
        tB_div = 1
        for c in range(cap, 0, -1):
            if B % c == 0:
                tB_div = c
                break
        # Prefer an exact divisor of B (no clipped tail block) unless it
        # wastes more than half of the budgeted slab.
        if tB_div * 2 >= cap:
            tB = tB_div

    # Batch is the fastest grid axis -> the pos block stays resident across
    # consecutive steps (only re-fetched at t-block boundaries).
    grid = (T_pad // tT, pl.cdiv(B, tB))

    out = pl.pallas_call(
        _add_pos_kernel,
        out_shape=jax.ShapeDtypeStruct((B, T_pad, D), x.dtype),
        grid_spec=pltpu.PrefetchScalarGridSpec(
            num_scalar_prefetch=0,
            grid=grid,
            in_specs=[
                pl.BlockSpec((tB, tT, D), lambda t, b: (b, t, 0)),  # x
                pl.BlockSpec((tT, D), lambda t, b: (t, 0)),         # pos
            ],
            out_specs=pl.BlockSpec((tB, tT, D), lambda t, b: (b, t, 0)),
        ),
        compiler_params=pltpu.CompilerParams(
            dimension_semantics=("parallel", "parallel"),
        ),
    )(x, pos_table)

    if T_pad != T:
        out = out[:, :T, :]
    return out


def learned_positional_encoding(x, pos_table):
    """x: (B, T, D); pos_table: (max_len, D). Returns x + pos_table[:T]."""
    B, T, D = x.shape
    max_len = pos_table.shape[0]

    # Keep the add native in x's dtype (avoid f32 promotion of a bf16 stream
    # and halve the resident pos footprint on VMEM-tight chips).
    if pos_table.dtype != x.dtype:
        pos_table = pos_table.astype(x.dtype)

    # Lane-density rewrite: if D is not a multiple of 128, fold k consecutive
    # positions into the lane dim (row-major contiguity-preserving reshape, no
    # data movement) so the store path is full-width.
    if D % 128 != 0:
        k = math.lcm(D, 128) // D
        if k > 1 and T % k == 0 and max_len % k == 0:
            x2 = x.reshape(B, T // k, k * D)
            pos2 = pos_table.reshape(max_len // k, k * D)
            return _pallas_add_pos(x2, pos2).reshape(B, T, D)

    return _pallas_add_pos(x, pos_table)


if __name__ == "__main__":
    # Small shapes consistent with the module's forward: (B, T, D), max_len >= T.
    B, T, D = 2, 8, 32
    MAX_LEN = 16

    key = jax.random.PRNGKey(0)
    k_x, k_w = jax.random.split(key)

    # Deterministic parameter init (nn.Embedding default ~ N(0, 1)).
    pos_embed_weight = jax.random.normal(k_w, (MAX_LEN, D), dtype=jnp.float32)
    x = jax.random.normal(k_x, (B, T, D), dtype=jnp.float32)

    out = jax.block_until_ready(learned_positional_encoding(x, pos_embed_weight))

    # Reference check in plain JAX.
    ref = x + pos_embed_weight[:T][None, :, :]
    assert out.shape == (B, T, D)
    assert jnp.allclose(out, ref, atol=1e-6), "mismatch vs reference"

    print("KERNEL_OK")
</pallas_src>

<mosaic_0001>
module attributes {stable_mosaic.version = 11 : i64} {
  func.func @_add_pos_kernel(%arg0: i32, %arg1: i32, %arg2: memref<2x8x128xf32, #tpu.memory_space<vmem>>, %arg3: memref<8x128xf32, #tpu.memory_space<vmem>>, %arg4: memref<2x8x128xf32, #tpu.memory_space<vmem>>) attributes {dimension_semantics = [#tpu.dimension_semantics<parallel>, #tpu.dimension_semantics<parallel>], iteration_bounds = array<i64: 1, 1>, scalar_prefetch = 0 : i64, scratch_operands = 0 : i64, tpu.core_type = #tpu.core_type<tc>, window_params = [{transform_indices = @transform_0, window_bounds = array<i64: 2, 8, 128>}, {transform_indices = @transform_1, window_bounds = array<i64: 8, 128>}, {transform_indices = @transform_2, window_bounds = array<i64: 2, 8, 128>}]} {
    %c0 = arith.constant 0 : index
    %c0_0 = arith.constant 0 : index
    %c0_1 = arith.constant 0 : index
    %0 = vector.load %arg2[%c0, %c0_0, %c0_1] : memref<2x8x128xf32, #tpu.memory_space<vmem>>, vector<2x8x128xf32>
    %c0_2 = arith.constant 0 : index
    %c0_3 = arith.constant 0 : index
    %1 = vector.load %arg3[%c0_2, %c0_3] : memref<8x128xf32, #tpu.memory_space<vmem>>, vector<8x128xf32>
    %2 = vector.shape_cast %1 : vector<8x128xf32> to vector<1x8x128xf32>
    %3 = vector.broadcast %2 : vector<1x8x128xf32> to vector<2x8x128xf32>
    %4 = arith.addf %0, %3 : vector<2x8x128xf32>
    %c0_4 = arith.constant 0 : index
    %c0_5 = arith.constant 0 : index
    %c0_6 = arith.constant 0 : index
    %5 = vector.load %arg4[%c0_4, %c0_5, %c0_6] : memref<2x8x128xf32, #tpu.memory_space<vmem>>, vector<2x8x128xf32>
    tpu.vector_store %arg4[%c0_4, %c0_5, %c0_6], %4 {strides = array<i32>} : memref<2x8x128xf32, #tpu.memory_space<vmem>>, vector<2x8x128xf32>,
    return
  }
  func.func @transform_0(%arg0: i32, %arg1: i32) -> (i32, i32, i32) {
    %c0_i32 = arith.constant 0 : i32
    %c0_i32_0 = arith.constant 0 : i32
    return %arg1, %arg0, %c0_i32 : i32, i32, i32
  }
  func.func @transform_1(%arg0: i32, %arg1: i32) -> (i32, i32) {
    %c0_i32 = arith.constant 0 : i32
    %c0_i32_0 = arith.constant 0 : i32
    return %arg0, %c0_i32 : i32, i32
  }
  func.func @transform_2(%arg0: i32, %arg1: i32) -> (i32, i32, i32) {
    %c0_i32 = arith.constant 0 : i32
    %c0_i32_0 = arith.constant 0 : i32
    return %arg1, %arg0, %c0_i32 : i32, i32, i32
  }
}

</mosaic_0001>

<bundles_post_ra>
// kernel: tpu_custom_call.1
= control target key start
LH: loop header
LB: loop body
LE: loop exit
PB: predicated region body
PF: predicated region fallthrough
CT: control target
= control target key end

     0   :  { %7 = vsyncpa [#allocation3], 0  ;;  %s208_s0 = inlined_call_operand.hbm [shape: f32[2,8,128], index: 0, kind: input, shape index: {}]   ;;  %s209_s1 = inlined_call_operand.hbm [shape: f32[4,128], index: 1, kind: input, shape index: {}]   ;;  %s210_s2 = inlined_call_operand.hbm [shape: f32[2,8,128], index: 2, kind: output, shape index: {}]  }
   0x1   :  { %8 = vsyncpa [#allocation6], 0 }
   0x2   :  { %9 = vsyncpa [#allocation4], 0  ;;  %s144_s9 = smov [#allocation2]   ;;  %s72_s13 = scalar_lea.hbm %s208_s0, 256 }
   0x3   :  { %s15_s10 = sshll.u32 %s144_s9, 4  ;;  %p73_p0 = scmp.ne.s32.totalorder %s208_s0, %s72_s13  ;;  %s16_s10 = int_to_ptr.vmem [resolvable:$true] %s15_s10 }
   0x4   :  { %p76_p1 = scmp.lt.u32.totalorder %s72_s13, %s208_s0 }
   0x6   :  { %p78_p2 = pnand %p76_p1, %p73_p0 }
   0x8   :  { %81 = shalt.err (!%p78_p2)
}
   0x9   :  { %s82_s18 = scalar_lea.vmem %s16_s10, 256  ;;  %p87_p4 = scmp.lt.s32.totalorder %s16_s10, %s16_s10 }
   0xa   :  { %p83_p3 = scmp.ne.s32.totalorder %s16_s10, %s82_s18  ;;  %p88_p5 = scmp.lt.s32.totalorder %s82_s18, %s82_s18 }
   0xc   :  { %p89_p6 = por %p88_p5, %p87_p4 }
   0xe   :  { %p90_p7 = pnand %p89_p6, %p83_p3 }
  0x10   :  { %93 = shalt.err (!%p90_p7)
}
  0x11   :  { %s145_s19 = smov 128   ;;  %s146_s20 = smov 8  }
  0x12   :  { %21 = dma.hbm_to_vmem [thread:$0]  %s208_s0, 256, %s16_s10, [#allocation3], %s145_s19, %s145_s19, %s146_s20  }
  0x13   :  { %26 = vsyncadd [#allocation6], 64  ;;  %s147_s23 = smov [#allocation5]   ;;  %s94_s27 = scalar_lea.hbm %s209_s1, 64 }
  0x14   :  { %s27_s24 = sshll.u32 %s147_s23, 4  ;;  %p95_p8 = scmp.ne.s32.totalorder %s209_s1, %s94_s27  ;;  %s28_s24 = int_to_ptr.vmem [resolvable:$true] %s27_s24 }
  0x15   :  { %p98_p9 = scmp.lt.u32.totalorder %s94_s27, %s209_s1 }
  0x17   :  { %p100_p10 = pnand %p98_p9, %p95_p8 }
  0x19   :  { %103 = shalt.err (!%p100_p10)
}
  0x1a   :  { %s104_s4 = scalar_lea.vmem %s28_s24, 64  ;;  %s108_s0 = scalar_lea.vmem %s28_s24, 128 }
  0x1b   :  { %p105_p11 = scmp.ne.s32.totalorder %s28_s24, %s104_s4  ;;  %p109_p12 = scmp.lt.s32.totalorder %s28_s24, %s28_s24 }
  0x1c   :  { %p110_p13 = scmp.lt.s32.totalorder %s108_s0, %s104_s4 }
  0x1e   :  { %p111_p0 = por %p110_p13, %p109_p12 }
  0x20   :  { %p112_p1 = pnand %p111_p0, %p105_p11 }
  0x22   :  { %115 = shalt.err (!%p112_p1)
}
  0x23   :  { %s148_s5 = smov 64   ;;  %s149_s6 = smov 4  }
  0x24   :  { %33 = dma.hbm_to_vmem [thread:$0]  %s209_s1, 64, %s28_s24, [#allocation6], %s148_s5, %s148_s5, %s149_s6  }
  0x25   :  { %138 = dma.done.wait [#allocation3], 256  }
  0x26   :  { %139 = vsyncadd [#allocation3], 4294967040 }
  0x27   :  { %140 = dma.done.wait [#allocation6], 128  }
  0x28   :  { %141 = vsyncadd [#allocation6], 4294967168  ;;  %s150_s9 = smov [#allocation7]   ;;  %v40_v0 = vld [vmem:[#allocation2] sm:$0xff]  ;;  %v42_v1 = vld [vmem:[#allocation5] sm:$0xff] }
  0x29   :  { %s52_s10 = sshll.u32 %s150_s9, 4  ;;  %v41_v2 = vld [vmem:[#allocation2 + $0x8] sm:$0xff]  ;;  %v43_v3 = vadd.f32 %v42_v1, %v40_v0  ;;  %s53_s10 = int_to_ptr.vmem [resolvable:$true] %s52_s10 }
  0x2a   :  { %v44_v4 = vadd.f32 %v42_v1, %v41_v2  ;;  %s116_s11 = scalar_lea.vmem %s53_s10, 256  ;;  %p121_p3 = scmp.lt.s32.totalorder %s53_s10, %s53_s10 }
  0x2b   :  { %45 = vst [vmem:[#allocation7] sm:$0xff] %v43_v3  ;;  %p117_p2 = scmp.ne.s32.totalorder %s53_s10, %s116_s11  ;;  %p122_p4 = scmp.lt.s32.totalorder %s116_s11, %s116_s11 }
  0x2c   :  { %46 = vst [vmem:[#allocation7 + $0x8] sm:$0xff] %v44_v4 }
  0x2d   :  { %p123_p5 = por %p122_p4, %p121_p3 }
  0x2f   :  { %p124_p6 = pnand %p123_p5, %p117_p2 }
  0x31   :  { %127 = shalt.err (!%p124_p6)
}
  0x32   :  { %s128_s13 = scalar_lea.hbm %s210_s2, 256 }
  0x33   :  { %p129_p7 = scmp.ne.s32.totalorder %s210_s2, %s128_s13  ;;  %p132_p8 = scmp.lt.u32.totalorder %s128_s13, %s210_s2 }
  0x35   :  { %p134_p9 = pnand %p132_p8, %p129_p7 }
  0x37   :  { %137 = shalt.err (!%p134_p9)
}
  0x38   :  { %58 = dma.vmem_to_hbm [thread:$0]  %s53_s10, 256, %s210_s2, [#allocation4], %s145_s19, %s145_s19, %s146_s20  }
  0x39   :  { %142 = dma.done.wait [#allocation4], 256  }
  0x3a   :  { %143 = vsyncadd [#allocation4], 4294967040 }
  0x3b   :  { %62 = vsyncpa [#allocation3], 1 }
  0x3c   :  { %63 = vsyncpa [#allocation6], 1 }
  0x3d   :  { %64 = vsyncpa [#allocation4], 1 }

</bundles_post_ra>
